<compile_context>
chip_gen: v7x
topology: tpu7x:2x2x1
jax: 0.10.0
libtpu: 0.0.40
codegen_flags: <defaults>
</compile_context>

<pallas_src>
import math

import jax
import jax.numpy as jnp
from jax.experimental import pallas as pl
from jax.experimental.pallas import tpu as pltpu


# --------------------------------------------------------------------------
# Small helpers
# --------------------------------------------------------------------------
def _cdiv(a, b):
    return -(-a // b)


def _round_up(a, b):
    return _cdiv(a, b) * b


def _sublane_multiple(itemsize):
    # Sub-32-bit dtypes pack along sublanes: bf16 -> 16 rows/vreg, int8 -> 32.
    return {4: 8, 2: 16, 1: 32}.get(itemsize, 8)


def _vmem_capacity_bytes():
    """Per-TensorCore VMEM capacity; conservative (v7x) fallback if unknown."""
    try:
        info = pltpu.get_tpu_info()
        for attr in ("vmem_capacity_bytes", "vmem_bytes", "vmem_size_bytes"):
            v = getattr(info, attr, None)
            if v:
                return int(v)
    except Exception:
        pass
    return 64 << 20  # v7x per-TC VMEM — safe everywhere


def _tile_candidates(total, align=128):
    """Divisors of `total` that are multiples of `align` (plus total), descending."""
    cands = {total}
    if total % align == 0:
        blocks = total // align
        for q in range(1, blocks + 1):
            if blocks % q == 0:
                cands.add(q * align)
    return sorted(cands, reverse=True)


def _footprint_bytes(row, n, k, vocab, in_isz, out_isz):
    """Approximate VMEM footprint of one grid step (double-buffered blocks)."""
    fused = n == vocab
    acc = row * n * 4                       # persistent f32 accumulator
    xblk = 2 * row * k * in_isz
    wblk = 2 * k * n * in_isz
    bblk = 2 * n * in_isz
    if fused:
        oblk = 2 * row * n * out_isz        # final output block
        misc = 0
    else:
        oblk = 2 * row * n * 4              # f32 unnormalized-logits block
        misc = 4 * row * 4 + 2 * row * 4    # lse out block + (m, l) scratch
    return acc + xblk + wblk + bblk + oblk + misc


def _select_tiles(m, d_model, vocab, in_isz, out_isz, budget):
    sub = _sublane_multiple(in_isz)
    m_r = _round_up(m, sub)
    row_tile = min(512, m_r)
    if row_tile >= m_r and m_r > sub:
        # Ensure >=2 row tiles so both v7x TensorCores get work.
        row_tile = _round_up(_cdiv(m_r, 2), sub)

    n_cands = _tile_candidates(vocab)
    k_cands = _tile_candidates(d_model)

    rt = row_tile
    while True:
        for n in n_cands:           # prefer full vocab (fused, no HBM roundtrip)
            for k in k_cands:
                if _footprint_bytes(rt, n, k, vocab, in_isz, out_isz) <= budget:
                    return rt, n, k
        if rt <= sub:
            # TODO(synk): vocab not 128-divisible AND too large for VMEM would
            # need vocab padding; fall back to the smallest tiles here.
            return rt, n_cands[-1], k_cands[-1]
        rt = max(sub, _round_up(rt // 2, sub))


# --------------------------------------------------------------------------
# Kernels
# --------------------------------------------------------------------------
def _fused_kernel(x_ref, w_ref, b_ref, o_ref, acc_ref):
    """Single pass: full-vocab block per row tile.  grid = (M_tiles, K_tiles)."""
    k = pl.program_id(1)

    @pl.when(k == 0)
    def _():
        # Fold the bias into the accumulator init (saves an epilogue VPU pass).
        acc_ref[...] = jnp.broadcast_to(
            b_ref[...].astype(jnp.float32), acc_ref.shape)

    acc_ref[...] += jnp.dot(x_ref[...], w_ref[...],
                            preferred_element_type=jnp.float32)

    @pl.when(k == pl.num_programs(1) - 1)
    def _():
        logits = acc_ref[...]
        mx = jnp.max(logits, axis=-1, keepdims=True)
        lse = mx + jnp.log(jnp.sum(jnp.exp(logits - mx), axis=-1, keepdims=True))
        o_ref[...] = (logits - lse).astype(o_ref.dtype)


def _pass1_kernel(x_ref, w_ref, b_ref, logits_ref, lse_ref,
                  acc_ref, m_ref, l_ref):
    """Vocab-tiled pass: unnormalized logits + online logsumexp.

    grid = (M_tiles, N_tiles, K_tiles); (m, l) scratch carries across N.
    """
    j = pl.program_id(1)
    k = pl.program_id(2)
    nj = pl.num_programs(1)
    nk = pl.num_programs(2)

    @pl.when(jnp.logical_and(j == 0, k == 0))
    def _():
        m_ref[...] = jnp.full_like(m_ref, -jnp.inf)
        l_ref[...] = jnp.zeros_like(l_ref)

    @pl.when(k == 0)
    def _():
        acc_ref[...] = jnp.broadcast_to(
            b_ref[...].astype(jnp.float32), acc_ref.shape)

    acc_ref[...] += jnp.dot(x_ref[...], w_ref[...],
                            preferred_element_type=jnp.float32)

    @pl.when(k == nk - 1)
    def _():
        logits = acc_ref[...]
        logits_ref[...] = logits
        blk_max = jnp.max(logits, axis=-1, keepdims=True)
        m_prev = m_ref[...]
        m_new = jnp.maximum(m_prev, blk_max)
        l_ref[...] = l_ref[...] * jnp.exp(m_prev - m_new) + jnp.sum(
            jnp.exp(logits - m_new), axis=-1, keepdims=True)
        m_ref[...] = m_new

    @pl.when(jnp.logical_and(j == nj - 1, k == nk - 1))
    def _():
        lse_ref[...] = m_ref[...] + jnp.log(l_ref[...])


def _pass2_kernel(logits_ref, lse_ref, o_ref):
    """Normalization sweep: out = (logits - lse).astype(out dtype)."""
    o_ref[...] = (logits_ref[...] - lse_ref[...]).astype(o_ref.dtype)


# --------------------------------------------------------------------------
# Wrapper
# --------------------------------------------------------------------------
def generator(x, w_t, bias, *, row_tile=None, n_tile=None, k_tile=None,
              mxu_dtype=None):
    """log_softmax(x @ w_t + bias, axis=-1).

    x:    (..., d_model)
    w_t:  (d_model, vocab) — nn.Linear weight pre-transposed ONCE at
          parameter-load time (lane-dense MXU RHS; no per-call HBM transpose).
    bias: (vocab,)
    mxu_dtype: optionally cast MXU operands (e.g. jnp.bfloat16) while keeping
          f32 accumulation and f32 log_softmax.
    """
    *lead, d_model = x.shape
    dm2, vocab = w_t.shape
    assert dm2 == d_model, (w_t.shape, d_model)
    assert bias.shape == (vocab,)
    out_dtype = x.dtype

    m = 1
    for s in lead:
        m *= s
    x2 = x.reshape(m, d_model)

    if mxu_dtype is not None and x2.dtype != jnp.dtype(mxu_dtype):
        # TODO(synk): for repeated calls the weight cast (like the transpose)
        # belongs at parameter-load time, not per call.
        x2 = x2.astype(mxu_dtype)
        w_t = w_t.astype(mxu_dtype)
    b2 = bias.reshape(1, vocab)

    in_isz = jnp.dtype(x2.dtype).itemsize
    out_isz = jnp.dtype(out_dtype).itemsize

    # Per-generation VMEM budget: ~56 MiB on v7x (64 MiB/TC), ~100 MiB elsewhere.
    vmem_cap = _vmem_capacity_bytes()
    gen_limit = min(int(vmem_cap * 0.875), 100 << 20)
    budget = int(gen_limit * 0.8)

    auto_rt, auto_nt, auto_kt = _select_tiles(
        m, d_model, vocab, in_isz, out_isz, budget)
    sub = _sublane_multiple(in_isz)
    row_tile = _round_up(row_tile, sub) if row_tile is not None else auto_rt
    n_tile = n_tile if n_tile is not None else auto_nt
    k_tile = k_tile if k_tile is not None else auto_kt
    assert vocab % n_tile == 0, "n_tile must divide vocab"
    assert d_model % k_tile == 0, "k_tile must divide d_model"

    m_pad = _round_up(max(m, row_tile), row_tile)
    if m_pad != m:
        # Padded rows produce harmless log_softmax(bias) values; sliced below.
        x2 = jnp.pad(x2, ((0, m_pad - m), (0, 0)))

    footprint = _footprint_bytes(row_tile, n_tile, k_tile, vocab, in_isz, out_isz)
    vmem_limit = min(gen_limit, max(int(footprint * 1.25) + (2 << 20), 16 << 20))

    n_row_tiles = m_pad // row_tile
    n_vocab_tiles = vocab // n_tile
    n_k_tiles = d_model // k_tile

    if n_tile == vocab:
        # ---------------- fused single-pass kernel ----------------
        cost = pl.CostEstimate(
            flops=2 * m_pad * d_model * vocab + 5 * m_pad * vocab,
            transcendentals=m_pad * vocab,
            bytes_accessed=(m_pad * d_model * in_isz
                            + n_row_tiles * d_model * vocab * in_isz  # W re-streamed per row tile
                            + vocab * in_isz
                            + m_pad * vocab * out_isz),
        )
        out = pl.pallas_call(
            _fused_kernel,
            out_shape=jax.ShapeDtypeStruct((m_pad, vocab), out_dtype),
            grid_spec=pltpu.PrefetchScalarGridSpec(
                num_scalar_prefetch=0,
                grid=(n_row_tiles, n_k_tiles),
                in_specs=[
                    pl.BlockSpec((row_tile, k_tile), lambda i, k: (i, k)),
                    pl.BlockSpec((k_tile, vocab), lambda i, k: (k, 0)),
                    pl.BlockSpec((1, vocab), lambda i, k: (0, 0)),
                ],
                out_specs=pl.BlockSpec((row_tile, vocab), lambda i, k: (i, 0)),
                scratch_shapes=[pltpu.VMEM((row_tile, vocab), jnp.float32)],
            ),
            compiler_params=pltpu.CompilerParams(
                dimension_semantics=("parallel", "arbitrary"),
                vmem_limit_bytes=vmem_limit,
            ),
            cost_estimate=cost,
        )(x2, w_t, b2)
    else:
        # ---------------- two-pass: vocab-tiled online logsumexp ----------------
        cost1 = pl.CostEstimate(
            flops=2 * m_pad * d_model * vocab + 6 * m_pad * vocab,
            transcendentals=m_pad * vocab,
            bytes_accessed=(n_vocab_tiles * m_pad * d_model * in_isz
                            + n_row_tiles * d_model * vocab * in_isz
                            + vocab * in_isz
                            + m_pad * vocab * 4 + m_pad * 4),
        )
        logits, lse = pl.pallas_call(
            _pass1_kernel,
            out_shape=(jax.ShapeDtypeStruct((m_pad, vocab), jnp.float32),
                       jax.ShapeDtypeStruct((m_pad, 1), jnp.float32)),
            grid_spec=pltpu.PrefetchScalarGridSpec(
                num_scalar_prefetch=0,
                grid=(n_row_tiles, n_vocab_tiles, n_k_tiles),
                in_specs=[
                    pl.BlockSpec((row_tile, k_tile), lambda i, j, k: (i, k)),
                    pl.BlockSpec((k_tile, n_tile), lambda i, j, k: (k, j)),
                    pl.BlockSpec((1, n_tile), lambda i, j, k: (0, j)),
                ],
                out_specs=(
                    pl.BlockSpec((row_tile, n_tile), lambda i, j, k: (i, j)),
                    pl.BlockSpec((row_tile, 1), lambda i, j, k: (i, 0)),
                ),
                scratch_shapes=[
                    pltpu.VMEM((row_tile, n_tile), jnp.float32),  # accumulator
                    pltpu.VMEM((row_tile, 1), jnp.float32),       # running max
                    pltpu.VMEM((row_tile, 1), jnp.float32),       # running sumexp
                ],
            ),
            compiler_params=pltpu.CompilerParams(
                dimension_semantics=("parallel", "arbitrary", "arbitrary"),
                vmem_limit_bytes=vmem_limit,
            ),
            cost_estimate=cost1,
        )(x2, w_t, b2)

        cost2 = pl.CostEstimate(
            flops=m_pad * vocab,
            transcendentals=0,
            bytes_accessed=m_pad * vocab * 4 + m_pad * 4 + m_pad * vocab * out_isz,
        )
        out = pl.pallas_call(
            _pass2_kernel,
            out_shape=jax.ShapeDtypeStruct((m_pad, vocab), out_dtype),
            grid_spec=pltpu.PrefetchScalarGridSpec(
                num_scalar_prefetch=0,
                grid=(n_row_tiles, n_vocab_tiles),
                in_specs=[
                    pl.BlockSpec((row_tile, n_tile), lambda i, j: (i, j)),
                    pl.BlockSpec((row_tile, 1), lambda i, j: (i, 0)),
                ],
                out_specs=pl.BlockSpec((row_tile, n_tile), lambda i, j: (i, j)),
            ),
            compiler_params=pltpu.CompilerParams(
                dimension_semantics=("parallel", "parallel"),
                vmem_limit_bytes=vmem_limit,
            ),
            cost_estimate=cost2,
        )(logits, lse)

    out = out[:m]
    return out.reshape(*lead, vocab)


# --------------------------------------------------------------------------
# Reference + self-test
# --------------------------------------------------------------------------
def _reference(x, weight, bias):
    """Pure-JAX reference mirroring the PyTorch Generator module."""
    logits = (
        jnp.einsum("...d,vd->...v",
                   x.astype(jnp.float32), weight.astype(jnp.float32))
        + bias.astype(jnp.float32)
    )
    return jax.nn.log_softmax(logits, axis=-1).astype(x.dtype)


if __name__ == "__main__":
    key = jax.random.PRNGKey(0)
    kx, kw, kb = jax.random.split(key, 3)

    batch, seq, d_model, vocab = 2, 8, 32, 256
    x = jax.random.normal(kx, (batch, seq, d_model), dtype=jnp.float32)
    weight = jax.random.normal(kw, (vocab, d_model), dtype=jnp.float32) / math.sqrt(
        d_model)
    bias = jax.random.normal(kb, (vocab,), dtype=jnp.float32) * 0.1

    # Parameter-load-time prep (once, outside the hot path): nn.Linear stores
    # W as (vocab, d_model); the kernel consumes the lane-dense transpose.
    w_t = jnp.swapaxes(weight, 0, 1)

    ref = _reference(x, weight, bias)

    # 1) auto-tiled path (small vocab -> fused single-pass kernel).
    out = jax.block_until_ready(generator(x, w_t, bias))
    assert out.shape == (batch, seq, vocab)
    assert out.dtype == x.dtype
    assert jnp.allclose(out, ref, atol=1e-4, rtol=1e-4), "fused path mismatch"

    # 2) forced vocab-tiled two-pass path (online logsumexp + normalization sweep).
    out2 = jax.block_until_ready(
        generator(x, w_t, bias, row_tile=8, n_tile=128, k_tile=d_model))
    assert jnp.allclose(out2, ref, atol=1e-4, rtol=1e-4), "two-pass path mismatch"

    # 3) bf16 MXU operands (f32 accumulation) — perf option for f32 params.
    out3 = jax.block_until_ready(generator(x, w_t, bias, mxu_dtype=jnp.bfloat16))
    assert out3.shape == (batch, seq, vocab)
    assert bool(jnp.all(jnp.isfinite(out3)))

    print("KERNEL_OK")
</pallas_src>

<mosaic_0001>
module attributes {stable_mosaic.version = 11 : i64} {
  func.func @_fused_kernel(%arg0: i32, %arg1: i32, %arg2: memref<8x32xf32, #tpu.memory_space<vmem>>, %arg3: memref<32x256xf32, #tpu.memory_space<vmem>>, %arg4: memref<1x256xf32, #tpu.memory_space<vmem>>, %arg5: memref<8x256xf32, #tpu.memory_space<vmem>>, %arg6: memref<8x256xf32, #tpu.memory_space<vmem>>) attributes {dimension_semantics = [#tpu.dimension_semantics<parallel>, #tpu.dimension_semantics<arbitrary>], iteration_bounds = array<i64: 2, 1>, scalar_prefetch = 0 : i64, scratch_operands = 1 : i64, tpu.core_type = #tpu.core_type<tc>, window_params = [{transform_indices = @transform_0, window_bounds = array<i64: 8, 32>}, {transform_indices = @transform_1, window_bounds = array<i64: 32, 256>}, {pipeline_mode = #tpu.pipeline_mode<synchronous>, transform_indices = @transform_2, window_bounds = array<i64: 1, 256>}, {transform_indices = @transform_3, window_bounds = array<i64: 8, 256>}]} {
    %c0_i32 = arith.constant 0 : i32
    %0 = arith.cmpi eq, %arg1, %c0_i32 : i32
    %1 = arith.extui %0 : i1 to i32
    %c0_i32_0 = arith.constant 0 : i32
    %2 = arith.cmpi ne, %1, %c0_i32_0 : i32
    scf.if %2 {
      %c0_10 = arith.constant 0 : index
      %c0_11 = arith.constant 0 : index
      %12 = vector.load %arg4[%c0_10, %c0_11] : memref<1x256xf32, #tpu.memory_space<vmem>>, vector<1x256xf32>
      %13 = vector.shape_cast %12 : vector<1x256xf32> to vector<1x256xf32>
      %14 = vector.broadcast %13 : vector<1x256xf32> to vector<8x256xf32>
      %c0_12 = arith.constant 0 : index
      %c0_13 = arith.constant 0 : index
      %15 = vector.load %arg6[%c0_12, %c0_13] : memref<8x256xf32, #tpu.memory_space<vmem>>, vector<8x256xf32>
      tpu.vector_store %arg6[%c0_12, %c0_13], %14 {strides = array<i32>} : memref<8x256xf32, #tpu.memory_space<vmem>>, vector<8x256xf32>,
    } else {
    }
    %c0 = arith.constant 0 : index
    %c0_1 = arith.constant 0 : index
    %3 = vector.load %arg6[%c0, %c0_1] : memref<8x256xf32, #tpu.memory_space<vmem>>, vector<8x256xf32>
    %c0_2 = arith.constant 0 : index
    %c0_3 = arith.constant 0 : index
    %4 = vector.load %arg2[%c0_2, %c0_3] : memref<8x32xf32, #tpu.memory_space<vmem>>, vector<8x32xf32>
    %c0_4 = arith.constant 0 : index
    %c0_5 = arith.constant 0 : index
    %5 = vector.load %arg3[%c0_4, %c0_5] : memref<32x256xf32, #tpu.memory_space<vmem>>, vector<32x256xf32>
    %cst = arith.constant dense<0.000000e+00> : vector<8x256xf32>
    %6 = tpu.matmul %4, %5, %cst {dimension_numbers = #tpu.dot_dimension_numbers<[1], [0], [0], [1], [0, 0, 1, 1], [], []>} : vector<8x32xf32>, vector<32x256xf32>, vector<8x256xf32> -> vector<8x256xf32>
    %7 = arith.addf %3, %6 : vector<8x256xf32>
    %c0_6 = arith.constant 0 : index
    %c0_7 = arith.constant 0 : index
    %8 = vector.load %arg6[%c0_6, %c0_7] : memref<8x256xf32, #tpu.memory_space<vmem>>, vector<8x256xf32>
    tpu.vector_store %arg6[%c0_6, %c0_7], %7 {strides = array<i32>} : memref<8x256xf32, #tpu.memory_space<vmem>>, vector<8x256xf32>,
    %c0_i32_8 = arith.constant 0 : i32
    %9 = arith.cmpi eq, %arg1, %c0_i32_8 : i32
    %10 = arith.extui %9 : i1 to i32
    %c0_i32_9 = arith.constant 0 : i32
    %11 = arith.cmpi ne, %10, %c0_i32_9 : i32
    scf.if %11 {
      %c0_10 = arith.constant 0 : index
      %c0_11 = arith.constant 0 : index
      %12 = vector.load %arg6[%c0_10, %c0_11] : memref<8x256xf32, #tpu.memory_space<vmem>>, vector<8x256xf32>
      %cst_12 = arith.constant dense<0xFF800000> : vector<8xf32>
      %13 = vector.multi_reduction <maximumf>, %12, %cst_12 [1] : vector<8x256xf32> to vector<8xf32>
      %14 = vector.shape_cast %13 : vector<8xf32> to vector<8x1xf32>
      %15 = vector.broadcast %14 : vector<8x1xf32> to vector<8x256xf32>
      %16 = arith.subf %12, %15 : vector<8x256xf32>
      %17 = math.exp %16 : vector<8x256xf32>
      %cst_13 = arith.constant dense<0.000000e+00> : vector<8xf32>
      %18 = vector.multi_reduction <add>, %17, %cst_13 [1] : vector<8x256xf32> to vector<8xf32>
      %19 = vector.shape_cast %18 : vector<8xf32> to vector<8x1xf32>
      %20 = math.log %19 : vector<8x1xf32>
      %21 = arith.addf %14, %20 : vector<8x1xf32>
      %22 = vector.broadcast %21 : vector<8x1xf32> to vector<8x256xf32>
      %23 = arith.subf %12, %22 : vector<8x256xf32>
      %c0_14 = arith.constant 0 : index
      %c0_15 = arith.constant 0 : index
      %24 = vector.load %arg5[%c0_14, %c0_15] : memref<8x256xf32, #tpu.memory_space<vmem>>, vector<8x256xf32>
      tpu.vector_store %arg5[%c0_14, %c0_15], %23 {strides = array<i32>} : memref<8x256xf32, #tpu.memory_space<vmem>>, vector<8x256xf32>,
    } else {
    }
    return
  }
  func.func @transform_0(%arg0: i32, %arg1: i32) -> (i32, i32) {
    %c0_i32 = arith.constant 0 : i32
    return %arg0, %arg1 : i32, i32
  }
  func.func @transform_1(%arg0: i32, %arg1: i32) -> (i32, i32) {
    %c0_i32 = arith.constant 0 : i32
    %c0_i32_0 = arith.constant 0 : i32
    return %arg1, %c0_i32 : i32, i32
  }
  func.func @transform_2(%arg0: i32, %arg1: i32) -> (i32, i32) {
    %c0_i32 = arith.constant 0 : i32
    %c0_i32_0 = arith.constant 0 : i32
    %c0_i32_1 = arith.constant 0 : i32
    return %c0_i32, %c0_i32_0 : i32, i32
  }
  func.func @transform_3(%arg0: i32, %arg1: i32) -> (i32, i32) {
    %c0_i32 = arith.constant 0 : i32
    %c0_i32_0 = arith.constant 0 : i32
    return %arg0, %c0_i32 : i32, i32
  }
}

</mosaic_0001>

<bundles_post_ra>
// kernel: tpu_custom_call.1
= control target key start
LH: loop header
LB: loop body
LE: loop exit
PB: predicated region body
PF: predicated region fallthrough
CT: control target
= control target key end

     0   :  { %8 = vsyncpa [#allocation4], 0  ;;  %s962_s0 = inlined_call_operand.hbm [shape: f32[16,32], index: 0, kind: input, shape index: {}]   ;;  %s963_s1 = inlined_call_operand.hbm [shape: f32[32,256], index: 1, kind: input, shape index: {}]   ;;  %s964_s2 = inlined_call_operand.vmem [shape: f32[1,256], index: 2, kind: input, shape index: {}]   ;;  %s965_s3 = inlined_call_operand.hbm [shape: f32[16,256], index: 3, kind: output, shape index: {}]  }
   0x1   :  { %10 = vsyncpa [#allocation4 + $0x1], 0 }
   0x2   :  { %11 = vsyncpa [#allocation7], 0 }
   0x3   :  { %12 = vsyncpa [#allocation5], 0 }
   0x4   :  { %14 = vsyncpa [#allocation5 + $0x1], 0  ;;  %s744_s12 = smov 0   ;;  %s746_s13 = smov 0  }
   0x5   :  { %s748_s14 = smov 0   ;;  %s750_s15 = smov 0  }
   0x6   :  { %s752_s16 = smov 0   ;;  %s754_s17 = smov 0  }
   0x7 LB: > { %s464_s18 = sadd.s32 4294967295, %s716_s17   ;;  %s465_s19 = sadd.s32 4294967294, %s716_s17   ;;  %s716_s17 = sphi %s754_s17, %s20_s17   ;;  %s712_s16 = sphi %s752_s16, %s989_s16   ;;  %s708_s15 = sphi %s750_s15, %s988_s15   ;;  %s704_s14 = sphi %s748_s14, %s987_s14   ;;  %s700_s13 = sphi %s746_s13, %s986_s13   ;;  %s696_s12 = sphi %s744_s12, %s985_s12  }
   0x8   : > { %p54_p0 = scmp.ne.s32.totalorder %s700_s13, %s696_s12  ;;  %p778_p1 = scmp.eq.s32.totalorder %s464_s18, 0 }
   0x9   : > { %p782_p2 = scmp.eq.s32.totalorder %s464_s18, 1  ;;  %p131_p3 = scmp.eq.s32.totalorder %s465_s19, 1 }
   0xa   : > { %s970_s20 = scalar_select %p778_p1, 1, 0 }
   0xb   : > { %s971_s21 = scalar_select %p782_p2, 1, 0 }
   0xc   : > { %p788_p4 = por %p778_p1, %p54_p0  ;;  %p466_p5 = scmp.ge.s32.totalorder %s716_s17, 1 }
   0xd   : > { %p793_p6 = por %p131_p3, %p54_p0  ;;  %p138_p7 = scmp.lt.s32.totalorder %s716_s17, 3 }
   0xe   : > { %s972_s22 = scalar_select %p788_p4, 1, 0 }
   0xf   : > { %s973_s23 = scalar_select %p793_p6, 1, 0 }
  0x10   : > { %p798_p8 = pnand %p466_p5, %p138_p7  ;;  %s718_s25 = smov [#allocation6]  }
  0x11   : > { %s154_s26 = sshll.u32 %s718_s25, 4  ;;  %s32_s28 = sadd.s32 1, %s712_s16  ;;  %s155_s26 = int_to_ptr.vmem [resolvable:$true] %s154_s26 }
  0x12   : > { %s974_s24 = scalar_select %p798_p8, 1, 0 }
  0x13   : > { %p498_p9 = pneg %p798_p8  ;;  %s572_s4 = scalar_lea.hbm %s963_s1, 1024 }
  0x14   : > { %p573_p12 = scmp.ne.s32.totalorder %s963_s1, %s572_s4  ;;  %p579_p5 = scmp.lt.u32.totalorder %s572_s4, %s963_s1 }
  0x15   : > { %p807_p11 = pnand %p498_p9, %p778_p1 }
  0x17   : > { %p574_p13 = pneg %p807_p11 }
  0x19   : > { %p575_p0 = pnand %p574_p13, %p573_p12 }
  0x1b   : > { %p576_p3 = pneg %p575_p0 }
  0x1d   : > { %p581_p7 = pnand %p579_p5, %p576_p3 }
  0x1f   : > { %584 = shalt.err (!%p581_p7)
}
  0x20   : > { %s585_s9 = scalar_lea.vmem %s155_s26, 1024  ;;  %p593_p1 = scmp.lt.s32.totalorder %s155_s26, %s155_s26 }
  0x21   : > { %p586_p9 = scmp.ne.s32.totalorder %s155_s26, %s585_s9  ;;  %p594_p4 = scmp.lt.s32.totalorder %s585_s9, %s585_s9 }
  0x23   : > { %p588_p10 = pnand %p586_p9, %p574_p13  ;;  %p595_p8 = por %p594_p4, %p593_p1 }
  0x25   : > { %p589_p6 = pneg %p588_p10 }
  0x27   : > { %p596_p2 = pnand %p595_p8, %p589_p6 }
  0x29   : > { %599 = shalt.err (!%p596_p2)
}
  0x2a   : > { %s719_s10 = smov 256   ;;  %s720_s11 = smov 16  }
  0x2b   : > { %501 = dma.hbm_to_vmem [thread:$0]  (!%p807_p11), %s963_s1, 1024, %s155_s26, [#allocation7], %s719_s10, %s719_s10, %s720_s11  }
  0x2c   : > { %p34_p1 = scmp.ge.s32.totalorder %s32_s28, 2  ;;  %s41_s25 = sadd.s32 1, %s704_s14 }
  0x2d   : > { %p48_p2 = scmp.ne.s32.totalorder %s704_s14, %s700_s13  ;;  %p49_p4 = scmp.eq.s32.totalorder %s716_s17, 0 }
  0x2e   : > { %s991_s28 = smov (%p34_p1, %s32_s28), 0  ;;  %p977_p8 = scmp.ne.s32.totalorder %s971_s21, 0 }
  0x2f   : > { %p834_p6 = por %p49_p4, %p48_p2  ;;  %s36_s27 = ssub.s32 %s712_s16, %s991_s28 }
  0x30   : > { %p840_p10 = por %p977_p8, %p48_p2  ;;  %p511_p12 = scmp.lt.s32.totalorder %s716_s17, 2 }
  0x31   : > { %p39_p11 = scmp.eq.s32.totalorder %s36_s27, 0  ;;  %s171_s26 = sand.u32 1, %s704_s14  }
  0x32   : > { %s469_s4 = sshll.u32 %s171_s26, 3  ;;  %s470_s6 = sshll.u32 %s712_s16, 7 }
  0x33   : > { %s849_s5 = scalar_select %p39_p11, %s704_s14, %s41_s25  }
  0x34   : > { %s855_s9 = scalar_lea.hbm %s962_s0, %s470_s6  ;;  %s175_s21 = scalar_lea.vmem [#allocation3], %s469_s4 }
  0x35   : > { %s183_s10 = sshll.u32 %s175_s21, 4  ;;  %p861_p13 = pnand %p511_p12, %p834_p6  ;;  %s857_s10 = int_to_ptr.vmem [resolvable:$true] %s183_s10 }
  0x36   : > { %s172_s18 = scalar_lea.sflag [#allocation4], %s171_s26  ;;  %s600_s19 = scalar_lea.hbm %s855_s9, 128 }
  0x37   : > { %p601_p0 = scmp.ne.s32.totalorder %s855_s9, %s600_s19  ;;  %p602_p3 = pneg %p861_p13 }
  0x38   : > { %s605_s4 = scalar_lea.hbm %s962_s0, 256  ;;  %p606_p9 = scmp.lt.u32.totalorder %s855_s9, %s962_s0 }
  0x39   : > { %p603_p5 = pnand %p602_p3, %p601_p0  ;;  %p607_p1 = scmp.lt.u32.totalorder %s605_s4, %s600_s19 }
  0x3a   : > { %p609_p4 = scmp.lt.u32.totalorder %s600_s19, %s855_s9 }
  0x3b   : > { %p604_p7 = pneg %p603_p5  ;;  %p608_p2 = por %p607_p1, %p606_p9 }
  0x3d   : > { %p610_p6 = por %p609_p4, %p608_p2 }
  0x3f   : > { %p611_p8 = pnand %p610_p6, %p604_p7 }
  0x41   : > { %614 = shalt.err (!%p611_p8)
}
  0x42   : > { %s615_s26 = scalar_lea.vmem %s857_s10, 128  ;;  %s721_s7 = smov [#allocation3]  }
  0x43   : > { %p616_p12 = scmp.ne.s32.totalorder %s857_s10, %s615_s26  ;;  %s620_s8 = sshll.u32 %s721_s7, 4  ;;  %s621_s8 = int_to_ptr.vmem [resolvable:$false] %s620_s8 }
  0x44   : > { %s622_s21 = scalar_lea.vmem %s621_s8, 256  ;;  %p623_p5 = scmp.lt.s32.totalorder %s857_s10, %s621_s8 }
  0x45   : > { %p618_p11 = pnand %p616_p12, %p602_p3  ;;  %p624_p9 = scmp.lt.s32.totalorder %s622_s21, %s615_s26 }
  0x47   : > { %p619_p0 = pneg %p618_p11  ;;  %p625_p1 = por %p624_p9, %p623_p5 }
  0x49   : > { %p626_p2 = pnand %p625_p1, %p619_p0 }
  0x4b   : > { %629 = shalt.err (!%p626_p2)
}
  0x4c   : > { %505 = dma.hbm_to_vmem [thread:$0]  (!%p861_p13), %s855_s9, 128, %s857_s10, %s172_s18  }
  0x4d   : > { %p980_p7 = scmp.ne.s32.totalorder %s974_s24, 0 }
  0x4e   : > { %s893_s19 = sand.u32 (!%p980_p7), 1, %s700_s13   ;;  %p981_p3 = scmp.ne.s32.totalorder (!%p980_p7), %s972_s22, 0 }
  0x4f   : > { %192 = sbr.rel (%p980_p7) target bundleno = 651 (0x28b), region = 32  ;;  %s472_s25 = sshll.u32 (!%p980_p7), %s893_s19, 3 }
  0x50   : > { %s195_s27 = scalar_lea.sflag (!%p980_p7), [#allocation4], %s893_s19  ;;  %s198_s4 = scalar_lea.vmem (!%p980_p7), [#allocation3], %s472_s25 }
  0x56   : > { %683 = dma.done.wait (%p981_p3), %s195_s27, 128  }
  0x57   : > { %685 = vsyncadd (%p981_p3), %s195_s27, 4294967168  ;;  %p982_p4 = scmp.ne.s32.totalorder %s970_s20, 0 }
  0x59   : > { %687 = dma.done.wait (%p982_p4), [#allocation7], 1024  }
  0x5a   : > { %689 = vsyncadd (%p982_p4), [#allocation7], 4294966272  ;;  %v722_v0 = vmov 0.0   ;;  %v248_v1 = vld [vmem:[#allocation6 + $0x8] sm:$0xff]  ;;  %v250_v2 = vld [vmem:[#allocation6 + $0x18] sm:$0xff]  ;;  %vm255_vm0 = vcmask 261120   ;;  %v232_v14 = vlaneseq }
  0x5b   : > { %323 = vmatprep.mubr.f32.mxu0 %v722_v0  ;;  %v247_v3 = vld [vmem:[#allocation6] sm:$0xff]  ;;  %v482_v4 = vpack.c.bf16 %v250_v2, %v248_v1  ;;  %v249_v5 = vld [vmem:[#allocation6 + $0x10] sm:$0xff]  ;;  %v252_v6 = vld [vmem:[#allocation6 + $0x28] sm:$0xff]  ;;  %s474_s24 = sshll.u32 %s893_s19, 4  ;;  %s481_s9 = sshll.u32 %s708_s15, 8 }
  0x5c   : > { %v254_v7 = vld [vmem:[#allocation6 + $0x38] sm:$0xff]  ;;  %v484_v8 = vpack.c.bf16 %v249_v5, %v247_v3  ;;  %v251_v10 = vld [vmem:[#allocation6 + $0x20] sm:$0xff]  ;;  %v253_v11 = vld [vmem:[#allocation6 + $0x30] sm:$0xff]  ;;  %v233_v15 = vshrl.u32 %v232_v14, 7  ;;  %s224_s10 = scalar_lea.vmem [#allocation8], %s474_s24  ;;  %s913_s6 = scalar_lea.hbm %s965_s3, %s481_s9 }
  0x5d   : > { %v486_v9 = vpack.c.bf16 %v254_v7, %v252_v6  ;;  %483 = vmatprep.subr.bf16.mxu0 %v482_v4  ;;  %v488_v12 = vpack.c.bf16 %v253_v11, %v251_v10  ;;  %v246_v13 = vld [vmem:[%s198_s4] sm:$0xff]  ;;  %s373_s11 = sshll.u32 %s224_s10, 4  ;;  %s359_s26 = scalar_lea.sflag [#allocation5], %s893_s19  ;;  %s915_s11 = int_to_ptr.vmem [resolvable:$true] %s373_s11 }
  0x5e   : > { %485 = vmatpush1.bf16.msra.mxu0 %v484_v8  ;;  %v234_v16 = vsub.s32 0, %v233_v15  ;;  %v230_v17 = vld [vmem:[%s964_s2] sm:$0x3]  ;;  %v238_v18 = vsub.s32 1, %v233_v15  ;;  %s630_s7 = scalar_lea.vmem %s915_s11, 256  ;;  %s723_s15 = smov [#allocation8]  }
  0x5f   : > { %487 = vmatprep.subr.bf16.mxu0 %v486_v9  ;;  %p631_p13 = scmp.ne.s32.totalorder %s915_s11, %s630_s7  ;;  %s634_s8 = sshll.u32 %s723_s15, 4  ;;  %s635_s8 = int_to_ptr.vmem [resolvable:$false] %s634_s8 }
  0x60   : > { %v235_v19 = vrot.slane %v230_v17, %v234_v16  ;;  %v239_v20 = vrot.slane %v230_v17, %v238_v18  ;;  %s636_s21 = scalar_lea.vmem %s635_s8, 512  ;;  %p637_p12 = scmp.lt.s32.totalorder %s915_s11, %s635_s8 }
  0x61   : > { %p632_p6 = pnand %p631_p13, %p840_p10  ;;  %p638_p11 = scmp.lt.s32.totalorder %s636_s21, %s630_s7 }
  0x62   : > { %489 = vmatpush1.bf16.msra.mxu0 %v488_v12 }
  0x63   : > { %p633_p8 = pneg %p632_p6  ;;  %p639_p0 = por %p638_p11, %p637_p12 }
  0x65   : > { %475 = vmatmul.mubr.msk.f32.vlgmr.msra.gmra.mrb[0].mxu0 %vm255_vm0, %v246_v13  ;;  %p640_p5 = pnand %p639_p0, %p633_p8 }
 0x138   : > { %v325_v21 = vpop.f32.mrb[0].mxu0 }
 0x139   : > { %v330_v22 = vadd.f32 %v325_v21, %v235_v19  ;;  %v327_v23 = vpop.f32.mrb[1].mxu0 }
 0x13a   : > { %v331_v24 = vadd.f32 %v327_v23, %v239_v20 }
 0x13c   : > { %v339_v25 = vmax.f32 %v330_v22, %v331_v24 }
 0x13e   : > { %340 = vmax.xlane.f32.xlu0 %v339_v25 }
 0x1cb   : > { %v341_v26 = vpop.xlane.xlu0 %340 }
 0x1cc   : > { %v342_v27 = vsub.f32 %v330_v22, %v341_v26  ;;  %v343_v28 = vsub.f32 %v331_v24, %v341_v26 }
 0x1ce   : > { %v344_v29 = vmul.f32 1.442695, %v342_v27  ;;  %v346_v30 = vmul.f32 1.442695, %v343_v28 }
 0x1d0   : > { %566 = vpow2.f32 %v344_v29 }
 0x1d1   : > { %568 = vpow2.f32 %v346_v30 }
 0x1da   : > { %v567_v31 = vpop.eup %566 }
 0x1db   : > { %v569_v32 = vpop.eup %568 }
 0x1dc   : > { %v348_v33 = vadd.f32 %v569_v32, %v567_v31 }
 0x1de   : > { %349 = vadd.xlane.f32.xlu0 %v348_v33 }
 0x26b   : > { %v350_v34 = vpop.xlane.xlu0 %349 }
 0x26c   : > { %570 = vlog2.f32 %v350_v34 }
 0x276   : > { %v571_v35 = vpop.eup %570 }
 0x277   : > { %v352_v36 = vmul.f32 0.6931472, %v571_v35 }
 0x279   : > { %v353_v37 = vadd.f32 %v352_v36, %v341_v26 }
 0x27b   : > { %v354_v38 = vsub.f32 %v330_v22, %v353_v37  ;;  %v355_v39 = vsub.f32 %v331_v24, %v353_v37 }
 0x27d   : > { %356 = vst [vmem:[%s224_s10] sm:$0xff] %v354_v38  ;;  %357 = vst [vmem:[%s224_s10 + $0x8] sm:$0xff] %v355_v39 }
 0x27e   : > { %643 = shalt.err (!%p640_p5)
}
 0x27f   : > { %s644_s19 = scalar_lea.hbm %s913_s6, 256  ;;  %s648_s4 = scalar_lea.hbm %s965_s3, 512 }
 0x280   : > { %p645_p9 = scmp.ne.s32.totalorder %s913_s6, %s644_s19  ;;  %p649_p7 = scmp.lt.u32.totalorder %s913_s6, %s965_s3 }
 0x281   : > { %p650_p3 = scmp.lt.u32.totalorder %s648_s4, %s644_s19  ;;  %p652_p13 = scmp.lt.u32.totalorder %s644_s19, %s913_s6 }
 0x282   : > { %p646_p1 = pnand %p645_p9, %p840_p10 }
 0x283   : > { %p651_p4 = por %p650_p3, %p649_p7 }
 0x284   : > { %p647_p2 = pneg %p646_p1 }
 0x285   : > { %p653_p6 = por %p652_p13, %p651_p4 }
 0x287   : > { %p654_p8 = pnand %p653_p6, %p647_p2 }
 0x289   : > { %657 = shalt.err (!%p654_p8)
}
 0x28a   : > { %496 = dma.vmem_to_hbm [thread:$0]  (%p840_p10), %s915_s11, 256, %s913_s6, %s359_s26  }
 0x28b PF: > { %s385_s24 = sand.u32 1, %s696_s12   ;;  %p983_p12 = scmp.ne.s32.totalorder %s973_s23, 0 }
 0x28c   : > { %p984_p11 = scmp.ge.s32.totalorder %s716_s17, 2  ;;  %s386_s9 = scalar_lea.sflag [#allocation5], %s385_s24 }
 0x28e   : > { %p507_p0 = pnand %p984_p11, %p983_p12 }
 0x290   : > { %691 = dma.done.wait (!%p507_p0), %s386_s9, 256  }
 0x291   : > { %693 = vsyncadd (!%p507_p0), %s386_s9, 4294967040  ;;  %s20_s17 = sadd.s32 1, %s716_s17   ;;  %s985_s12 = smov %s700_s13 }
 0x292   : > { %p17_p5 = scmp.ge.s32.totalorder %s20_s17, 4   ;;  %s986_s13 = smov %s704_s14 }
 0x293   : > { %s987_s14 = smov %s849_s5  ;;  %s988_s15 = smov %s712_s16 }
 0x294   : > { %s989_s16 = smov %s991_s28  ;;  %19 = sbr.rel (!%p17_p5) target bundleno = 7 (0x7), region = 90 }
 0x29b   :  { %391 = vsyncpa [#allocation4], 1 }
 0x29c   :  { %393 = vsyncpa [#allocation4 + $0x1], 1 }
 0x29d   :  { %394 = vsyncpa [#allocation7], 1 }
 0x29e   :  { %395 = vsyncpa [#allocation5], 1 }
 0x29f   :  { %397 = vsyncpa [#allocation5 + $0x1], 1 }

</bundles_post_ra>
